<compile_context>
chip_gen: v5e
topology: v5e:2x2
jax: 0.10.0
libtpu: 0.0.40
codegen_flags: <defaults>
</compile_context>

<pallas_src>
import jax
import jax.numpy as jnp
from jax.experimental import pallas as pl
from jax.experimental.pallas import tpu as pltpu


def _linear_seq_attn_kernel(x_ref, mask_ref, w_ref, out_ref):
    # x_ref:    (TB, L, H) VMEM block   (TB sequences)
    # mask_ref: (TB, L)    VMEM block   (nonzero = padding)
    # w_ref:    (1, H)     VMEM         (linear weight, shared across steps)
    # out_ref:  (TB, H)    VMEM block   (lane-dense output slab)
    x = x_ref[...].astype(jnp.float32)                       # (TB, L, H)
    w = w_ref[...].astype(jnp.float32)                       # (1, H) -> bcast

    # scores[b, l] = sum_h x[b, l, h] * w[h]   (lane-reduce over H, no x.T)
    scores = jnp.sum(x * w, axis=-1)                         # (TB, L)

    # masked_fill_(mask, -inf).  Bias omitted: softmax is shift-invariant.
    scores = jnp.where(mask_ref[...] > 0, -jnp.inf, scores)  # (TB, L)

    # Softmax over the sequence (lane) axis.
    # TODO(synk): an all-padding row yields NaN here, same as the PyTorch op.
    smax = jnp.max(scores, axis=-1, keepdims=True)           # (TB, 1)
    e = jnp.exp(scores - smax)                               # (TB, L)
    denom = jnp.sum(e, axis=-1, keepdims=True)               # (TB, 1)
    alpha = e * pl.reciprocal(denom, approx=True)            # (TB, L)

    # out[b, h] = sum_l alpha[b, l] * x[b, l, h]  (weighted sublane-reduce)
    out = jnp.sum(alpha[:, :, None] * x, axis=1)             # (TB, H)
    out_ref[...] = out.astype(out_ref.dtype)


def _pick_batch_tile(B, L, H, itemsize, vmem_budget_bytes):
    """Largest batch tile TB such that:
       * TB divides B,
       * TB == B or TB % 8 == 0 (keeps every BlockSpec trailing dim either
         full-extent or 8-aligned),
       * the double-buffered x slab (2 * TB * L * H * itemsize) fits budget,
    preferring >= 2 grid steps so the parallel axis can shard across cores."""
    divisors = [d for d in range(1, B + 1) if B % d == 0]
    candidates = [d for d in divisors if d == B or d % 8 == 0]
    fitting = [d for d in candidates
               if 2 * d * L * H * itemsize <= vmem_budget_bytes]
    if not fitting:
        fitting = [min(candidates)]
    multi_step = [d for d in fitting if B // d >= 2]
    return max(multi_step) if multi_step else max(fitting)


def linear_seq_attn(x, x_mask, weight, bias=None, *, vmem_budget_bytes=24 << 20):
    """x: (B, L, H); x_mask: (B, L), nonzero = padding; weight: (1, H); bias: (1,).

    `bias` is accepted for API parity with nn.Linear(H, 1) but unused: adding
    the same scalar to every score leaves the softmax output unchanged.
    """
    del bias  # shift-invariant under softmax
    B, L, H = x.shape
    TB = _pick_batch_tile(B, L, H, 4, vmem_budget_bytes)
    grid = (B // TB,)

    return pl.pallas_call(
        _linear_seq_attn_kernel,
        out_shape=jax.ShapeDtypeStruct((B, H), x.dtype),
        grid_spec=pltpu.PrefetchScalarGridSpec(
            num_scalar_prefetch=0,
            grid=grid,
            in_specs=[
                pl.BlockSpec((TB, L, H), lambda b: (b, 0, 0)),  # x slab
                pl.BlockSpec((TB, L), lambda b: (b, 0)),        # 2-D mask
                pl.BlockSpec((1, H), lambda b: (0, 0)),         # weight (shared)
            ],
            out_specs=pl.BlockSpec((TB, H), lambda b: (b, 0)),  # lane-dense out
        ),
        compiler_params=pltpu.CompilerParams(
            dimension_semantics=("parallel",),
            vmem_limit_bytes=48 << 20,   # above v5e's 16 MiB scoped default,
                                         # below v7x's 64 MiB physical VMEM
        ),
    )(x, x_mask, weight)


def _reference(x, x_mask, weight, bias):
    scores = jnp.einsum("blh,oh->bl", x, weight) + bias[0]    # (B, L)
    scores = jnp.where(x_mask > 0, -jnp.inf, scores)
    alpha = jax.nn.softmax(scores, axis=-1)
    return jnp.einsum("bl,blh->bh", alpha, x)


if __name__ == "__main__":
    B, L, H = 2, 8, 32
    key = jax.random.PRNGKey(0)
    kx, kw, kb = jax.random.split(key, 3)

    x = jax.random.normal(kx, (B, L, H), dtype=jnp.float32)
    # padding mask: last 3 positions of batch 0 and last 1 of batch 1 are padding
    valid_lens = jnp.array([L - 3, L - 1])
    x_mask = (jnp.arange(L)[None, :] >= valid_lens[:, None]).astype(jnp.float32)

    # Deterministic nn.Linear(H, 1) init (uniform in +/- 1/sqrt(H), PyTorch-style)
    bound = 1.0 / (H ** 0.5)
    weight = jax.random.uniform(kw, (1, H), jnp.float32, -bound, bound)
    bias = jax.random.uniform(kb, (1,), jnp.float32, -bound, bound)

    out = linear_seq_attn(x, x_mask, weight, bias)
    out = jax.block_until_ready(out)

    ref = _reference(x, x_mask, weight, bias)
    assert out.shape == (B, H)
    # Tolerance accounts for the EUP approximate reciprocal (~2^-12 rel err).
    assert jnp.allclose(out, ref, atol=2e-3, rtol=2e-3), (out, ref)

    print("KERNEL_OK")
</pallas_src>

<mosaic_0001>
module attributes {stable_mosaic.version = 11 : i64} {
  func.func @_linear_seq_attn_kernel(%arg0: i32, %arg1: memref<2x8x32xf32, #tpu.memory_space<vmem>>, %arg2: memref<2x8xf32, #tpu.memory_space<vmem>>, %arg3: memref<1x32xf32, #tpu.memory_space<vmem>>, %arg4: memref<2x32xf32, #tpu.memory_space<vmem>>) attributes {dimension_semantics = [#tpu.dimension_semantics<parallel>], iteration_bounds = array<i64: 1>, scalar_prefetch = 0 : i64, scratch_operands = 0 : i64, tpu.core_type = #tpu.core_type<tc>, window_params = [{transform_indices = @transform_0, window_bounds = array<i64: 2, 8, 32>}, {transform_indices = @transform_1, window_bounds = array<i64: 2, 8>}, {pipeline_mode = #tpu.pipeline_mode<synchronous>, transform_indices = @transform_2, window_bounds = array<i64: 1, 32>}, {transform_indices = @transform_3, window_bounds = array<i64: 2, 32>}]} {
    %c0 = arith.constant 0 : index
    %c0_0 = arith.constant 0 : index
    %c0_1 = arith.constant 0 : index
    %0 = vector.load %arg1[%c0, %c0_0, %c0_1] : memref<2x8x32xf32, #tpu.memory_space<vmem>>, vector<2x8x32xf32>
    %c0_2 = arith.constant 0 : index
    %c0_3 = arith.constant 0 : index
    %1 = vector.load %arg3[%c0_2, %c0_3] : memref<1x32xf32, #tpu.memory_space<vmem>>, vector<1x32xf32>
    %2 = vector.shape_cast %1 : vector<1x32xf32> to vector<1x1x32xf32>
    %3 = vector.broadcast %2 : vector<1x1x32xf32> to vector<2x8x32xf32>
    %4 = arith.mulf %0, %3 : vector<2x8x32xf32>
    %cst = arith.constant dense<0.000000e+00> : vector<2x8xf32>
    %5 = vector.multi_reduction <add>, %4, %cst [2] : vector<2x8x32xf32> to vector<2x8xf32>
    %c0_4 = arith.constant 0 : index
    %c0_5 = arith.constant 0 : index
    %6 = vector.load %arg2[%c0_4, %c0_5] : memref<2x8xf32, #tpu.memory_space<vmem>>, vector<2x8xf32>
    %cst_6 = arith.constant 0.000000e+00 : f32
    %7 = vector.broadcast %cst_6 : f32 to vector<2x8xf32>
    %8 = arith.cmpf ogt, %6, %7 : vector<2x8xf32>
    %cst_7 = arith.constant 0xFF800000 : f32
    %9 = vector.broadcast %cst_7 : f32 to vector<2x8xf32>
    %10 = arith.select %8, %9, %5 : vector<2x8xi1>, vector<2x8xf32>
    %cst_8 = arith.constant dense<0xFF800000> : vector<2xf32>
    %11 = vector.multi_reduction <maximumf>, %10, %cst_8 [1] : vector<2x8xf32> to vector<2xf32>
    %12 = vector.shape_cast %11 : vector<2xf32> to vector<2x1xf32>
    %13 = vector.broadcast %12 : vector<2x1xf32> to vector<2x8xf32>
    %14 = arith.subf %10, %13 : vector<2x8xf32>
    %15 = math.exp %14 : vector<2x8xf32>
    %cst_9 = arith.constant dense<0.000000e+00> : vector<2xf32>
    %16 = vector.multi_reduction <add>, %15, %cst_9 [1] : vector<2x8xf32> to vector<2xf32>
    %17 = vector.shape_cast %16 : vector<2xf32> to vector<2x1xf32>
    %18 = tpu.reciprocal %17 {approx = true} : vector<2x1xf32> -> vector<2x1xf32>
    %19 = vector.broadcast %18 : vector<2x1xf32> to vector<2x8xf32>
    %20 = arith.mulf %15, %19 : vector<2x8xf32>
    %21 = vector.shape_cast %20 : vector<2x8xf32> to vector<2x8x1xf32>
    %22 = vector.broadcast %21 : vector<2x8x1xf32> to vector<2x8x32xf32>
    %23 = arith.mulf %22, %0 : vector<2x8x32xf32>
    %cst_10 = arith.constant dense<0.000000e+00> : vector<2x32xf32>
    %24 = vector.multi_reduction <add>, %23, %cst_10 [1] : vector<2x8x32xf32> to vector<2x32xf32>
    %c0_11 = arith.constant 0 : index
    %c0_12 = arith.constant 0 : index
    %25 = vector.load %arg4[%c0_11, %c0_12] : memref<2x32xf32, #tpu.memory_space<vmem>>, vector<2x32xf32>
    tpu.vector_store %arg4[%c0_11, %c0_12], %24 {strides = array<i32>} : memref<2x32xf32, #tpu.memory_space<vmem>>, vector<2x32xf32>,
    return
  }
  func.func @transform_0(%arg0: i32) -> (i32, i32, i32) {
    %c0_i32 = arith.constant 0 : i32
    %c0_i32_0 = arith.constant 0 : i32
    %c0_i32_1 = arith.constant 0 : i32
    return %arg0, %c0_i32, %c0_i32_0 : i32, i32, i32
  }
  func.func @transform_1(%arg0: i32) -> (i32, i32) {
    %c0_i32 = arith.constant 0 : i32
    %c0_i32_0 = arith.constant 0 : i32
    return %arg0, %c0_i32 : i32, i32
  }
  func.func @transform_2(%arg0: i32) -> (i32, i32) {
    %c0_i32 = arith.constant 0 : i32
    %c0_i32_0 = arith.constant 0 : i32
    %c0_i32_1 = arith.constant 0 : i32
    return %c0_i32, %c0_i32_0 : i32, i32
  }
  func.func @transform_3(%arg0: i32) -> (i32, i32) {
    %c0_i32 = arith.constant 0 : i32
    %c0_i32_0 = arith.constant 0 : i32
    return %arg0, %c0_i32 : i32, i32
  }
}

</mosaic_0001>

<bundles_post_ra>
// kernel: tpu_custom_call.1
= control target key start
LH: loop header
LB: loop body
LE: loop exit
PB: predicated region body
PF: predicated region fallthrough
CT: control target
= control target key end

     0   :  { %8 = vsyncpa [#allocation3], 0  ;;  %s271_s0 = inlined_call_operand.hbm [shape: f32[2,8,32], index: 0, kind: input, shape index: {}]   ;;  %s272_s1 = inlined_call_operand.hbm [shape: f32[2,8], index: 1, kind: input, shape index: {}]   ;;  %s273_s2 = inlined_call_operand.vmem [shape: f32[1,32], index: 2, kind: input, shape index: {}]   ;;  %s274_s3 = inlined_call_operand.hbm [shape: f32[2,32], index: 3, kind: output, shape index: {}]  }
   0x1   :  { %9 = vsyncpa [#allocation6], 0 }
   0x2   :  { %10 = vsyncpa [#allocation4], 0  ;;  %s15_s14 = sshll.u32 %s271_s0, 4  ;;  %s228_s15 = smov [#allocation2]   ;;  %s16_s14 = int_to_ptr.hbm [resolvable:$true] %s15_s14 }
   0x3   :  { %s17_s16 = sshll.u32 %s228_s15, 4  ;;  %s29_s19 = sshll.u32 %s272_s1, 4  ;;  %s18_s16 = int_to_ptr.vmem [resolvable:$true] %s17_s16  ;;  %s30_s19 = int_to_ptr.hbm [resolvable:$true] %s29_s19 }
   0x4   :  { %s229_s20 = smov 128   ;;  %s230_s21 = smov 8  }
   0x5   :  { %23 = dma.hbm_to_vmem [thread:$0]  %s16_s14, 256, %s18_s16, [#allocation3], %s229_s20, %s229_s20, %s230_s21  }
   0x6   :  { %s231_s22 = smov [#allocation5]  }
   0x7   :  { %s31_s23 = sshll.u32 %s231_s22, 4  ;;  %s32_s23 = int_to_ptr.vmem [resolvable:$true] %s31_s23 }
   0x8   :  { %34 = dma.hbm_to_vmem [thread:$0]  %s30_s19, 32, %s32_s23, [#allocation6]  }
   0x9   :  { %222 = dma.done.wait [#allocation3], 256  }
   0xa   :  { %223 = vsyncadd [#allocation3], 4294967040 }
   0xb   :  { %224 = dma.done.wait [#allocation6], 32  }
   0xc   :  { %225 = vsyncadd [#allocation6], 4294967264  ;;  %v45_v0 = vld [vmem:[#allocation2] sm:$0xff]  ;;  %vm53_vm0 = vcmask 261120   ;;  %v46_v3 = vld [vmem:[#allocation2 + $0x8] sm:$0xff]  ;;  %v64_v8 = vlaneseq  ;;  %vm68_vm1 = vcmask 1041409  }
   0xd   :  { %v145_v1 = vld [vmem:[%s273_s2] ss:$0 sm:$0xff]  ;;  %v60_v10 = vld [vmem:[#allocation5] sm:$0x3]  ;;  %vm72_vm3 = vcmask 58368   ;;  %s232_s1 = smov [#allocation7]  }
   0xe   :  { %v51_v2 = vmul.f32 %v145_v1, %v45_v0  ;;  %v52_v5 = vmul.f32 %v145_v1, %v46_v3  ;;  %v65_v9 = vand.u32 127, %v64_v8  ;;  %vm61_vm2 = vcmp.gt.f32.partialorder %v60_v10, 0.0  ;;  %s125_s2 = sshll.u32 %s232_s1, 4  ;;  %s127_s27 = sshll.u32 %s274_s3, 4  ;;  %s126_s2 = int_to_ptr.vmem [resolvable:$true] %s125_s2  ;;  %s128_s27 = int_to_ptr.hbm [resolvable:$true] %s127_s27 }
   0xf   :  { %v86_v22 = vshrl.u32 %v64_v8, 7  ;;  %vm118_vm4 = vcmask 254976  }
  0x10   :  { %v54_v4 = vsel %vm53_vm0, %v51_v2, 0.0  ;;  %v57_v6 = vsel %vm53_vm0, %v52_v5, 0.0 }
  0x11   :  { %55 = vadd.xlane.f32.xlu0 %v54_v4  ;;  %143 = vset.pattern.permute.xlu2 %v86_v22 }
  0x12   :  { %144 = vset.pattern.permute.xlu0 %v86_v22 }
  0x19   :  { %58 = vadd.xlane.f32.xlu0 %v57_v6 }
  0x84   :  { %v56_v7 = vpop.xlane.xlu0 %55 }
  0x85   :  { %v66_v12 = vperm.slane %v56_v7, %v65_v9 }
  0x8c   :  { %v59_v11 = vpop.xlane.xlu0 %58 }
  0x8d   :  { %v67_v13 = vperm.slane %v59_v11, %v65_v9 }
  0x8f   :  { %v69_v14 = vsel %vm68_vm1, %v67_v13, %v66_v12 }
  0x90   :  { %v71_v15 = vsel %vm61_vm2, -inf, %v69_v14 }
  0x91   :  { %v73_v16 = vsel %vm72_vm3, %v71_v15, -inf }
  0x92   :  { %74 = vmax.xlane.f32.xlu1 %v73_v16 }
 0x105   :  { %v75_v17 = vpop.xlane.xlu1 %74 }
 0x106   :  { %v76_v18 = vsub.f32 %v71_v15, %v75_v17 }
 0x108   :  { %v77_v19 = vmul.f32 1.442695, %v76_v18 }
 0x10a   :  { %146 = vpow2.f32 %v77_v19 }
 0x110   :  { %v147_v20 = vpop.eup %146 }
 0x111   :  { %v79_v21 = vsel %vm72_vm3, %v147_v20, 0.0 }
 0x112   :  { %80 = vadd.xlane.f32.xlu1 %v79_v21 }
 0x185   :  { %v81_v23 = vpop.xlane.xlu1 %80 }
 0x186   :  { %148 = vrcp.f32 %v81_v23 }
 0x18c   :  { %v149_v24 = vpop.eup %148 }
 0x18d   :  { %v83_v25 = vmul.f32 %v149_v24, %v147_v20 }
 0x18f   :  { %v84_v26 = vperm.slane %v83_v25, 0  ;;  %v91_v27 = vperm.slane %v83_v25, 1 }
 0x191   :  { %89 = vperm.xlu2 %143, %v84_v26  }
 0x199   :  { %96 = vperm.xlu2 %143, %v91_v27  }
 0x1eb   :  { %v90_v28 = vpop.permute.xlu2 %89 }
 0x1ec   :  { %v98_v29 = vmul.f32 %v90_v28, %v45_v0 }
 0x1ee   :  { %v100_v30 = vsel %vm53_vm0, %v98_v29, 0.0 }
 0x1ef   :  { %v101_v31 = vrot.slane %v100_v30, 4 }
 0x1f1   :  { %v102_v32 = vadd.f32 %v101_v31, %v100_v30 }
 0x1f3   :  { %v97_v33 = vpop.permute.xlu2 %96  ;;  %v103_v35 = vrot.slane %v102_v32, 2 }
 0x1f4   :  { %v99_v34 = vmul.f32 %v97_v33, %v46_v3 }
 0x1f5   :  { %v104_v38 = vadd.f32 %v103_v35, %v102_v32 }
 0x1f6   :  { %v107_v36 = vsel %vm53_vm0, %v99_v34, 0.0 }
 0x1f7   :  { %v108_v37 = vrot.slane %v107_v36, 4  ;;  %v105_v41 = vrot.slane %v104_v38, 1 }
 0x1f9   :  { %v109_v39 = vadd.f32 %v108_v37, %v107_v36  ;;  %v106_v44 = vadd.f32 %v105_v41, %v104_v38 }
 0x1fb   :  { %v110_v40 = vrot.slane %v109_v39, 2 }
 0x1fd   :  { %v111_v42 = vadd.f32 %v110_v40, %v109_v39 }
 0x1ff   :  { %v112_v43 = vrot.slane %v111_v42, 1 }
 0x201   :  { %v113_v45 = vadd.f32 %v112_v43, %v111_v42 }
 0x203   :  { %v116_v46 = vsel %vm68_vm1, %v113_v45, %v106_v44 }
 0x204   :  { %119 = vst.msk [vmem:[#allocation7] sm:$0x3] %vm118_vm4, %v116_v46 }
 0x205   :  { %130 = dma.vmem_to_hbm [thread:$0]  %s126_s2, 32, %s128_s27, [#allocation4]  }
 0x206   :  { %226 = dma.done.wait [#allocation4], 32  }
 0x207   :  { %227 = vsyncadd [#allocation4], 4294967264 }
 0x208   :  { %135 = vsyncpa [#allocation3], 1 }
 0x209   :  { %136 = vsyncpa [#allocation6], 1 }
 0x20a   :  { %137 = vsyncpa [#allocation4], 1 }

</bundles_post_ra>
